<compile_context>
chip_gen: v6e
topology: v6e:2x2x1
jax: 0.10.0
libtpu: 0.0.40
codegen_flags: <defaults>
</compile_context>

<pallas_src>
import functools

import jax
import jax.numpy as jnp
from jax.experimental import pallas as pl
from jax.experimental.pallas import tpu as pltpu

_LANE = 128


def _round_up(x, m):
    return ((x + m - 1) // m) * m


def _pick_tb(B, max_tb=512):
    """Batch tile: large enough to amortize per-step overhead, small enough
    that the grid has >= 2 steps whenever B >= 16 (v7x megacore)."""
    tb = min(max_tb, _round_up(max(pl.cdiv(B, 2), 1), 8))
    return max(tb, 8)


def mlp_forecaster_kernel(x_ref,
                          w0_ref, b0_ref,
                          w1_ref, b1_ref,
                          w2_ref, b2_ref,
                          w3_ref, b3_ref,
                          o_ref):
    """Fused 3 x [Linear(+folded BN) -> ReLU] -> Linear -> clamp on one batch tile.

    The f32 input tile is cast to bf16 in-kernel (fused, no extra HBM pass);
    matmul operands are bf16 (MXU native), accumulation + element-wise in f32.
    """
    x = x_ref[...].astype(jnp.bfloat16)

    h = jnp.dot(x, w0_ref[...], preferred_element_type=jnp.float32)
    h = jnp.maximum(h + b0_ref[...], 0.0)

    h = jnp.dot(h.astype(jnp.bfloat16), w1_ref[...],
                preferred_element_type=jnp.float32)
    h = jnp.maximum(h + b1_ref[...], 0.0)

    h = jnp.dot(h.astype(jnp.bfloat16), w2_ref[...],
                preferred_element_type=jnp.float32)
    h = jnp.maximum(h + b2_ref[...], 0.0)

    out = jnp.dot(h.astype(jnp.bfloat16), w3_ref[...],
                  preferred_element_type=jnp.float32)
    out = out + b3_ref[...]
    o_ref[...] = jnp.clip(out, 0.001, 0.999).astype(o_ref.dtype)


@functools.partial(jax.jit, static_argnames=("out_features", "max_tb"))
def mlp_forecaster_forward(x, kernel_params, out_features, max_tb=512):
    """x: (B, ...) -> flattened to (B, F).  No batch padding; ragged last block."""
    B = x.shape[0]
    x2d = x.reshape(B, -1).astype(jnp.float32)   # flatten only; bf16 cast is in-kernel
    in_f = x2d.shape[1]

    w0, b0, w1, b1, w2, b2, w3, b3 = kernel_params
    hid = w0.shape[1]
    out_pad = w3.shape[1]

    tb = _pick_tb(B, max_tb)
    nb = pl.cdiv(B, tb)

    def const(shape):
        # Constant index_map: DMA'd once, stays VMEM-resident across the grid.
        return pl.BlockSpec(shape, lambda i: (0, 0))

    out = pl.pallas_call(
        mlp_forecaster_kernel,
        out_shape=jax.ShapeDtypeStruct((B, out_pad), jnp.float32),
        grid_spec=pltpu.PrefetchScalarGridSpec(
            num_scalar_prefetch=0,
            grid=(nb,),
            in_specs=[
                pl.BlockSpec((tb, in_f), lambda i: (i, 0)),
                const((in_f, hid)), const((1, hid)),
                const((hid, hid)), const((1, hid)),
                const((hid, hid)), const((1, hid)),
                const((hid, out_pad)), const((1, out_pad)),
            ],
            out_specs=pl.BlockSpec((tb, out_pad), lambda i: (i, 0)),
        ),
        compiler_params=pltpu.CompilerParams(
            dimension_semantics=("parallel",)),
    )(x2d, *kernel_params)
    # Lane-dense (B, 128) kernel output; only the column slice remains here.
    return out[:, :out_features]


def init_raw_params(key, in_features, hidden_units, out_features, num_layer=3):
    """PyTorch-layout Linear weights + eval-mode BatchNorm1d parameters."""
    eps = 1e-5
    dims = [in_features] + [hidden_units] * num_layer
    layers = []
    for li in range(num_layer):
        key, kw, kb, kg, kbeta, km = jax.random.split(key, 6)
        fan_in, fan_out = dims[li], dims[li + 1]
        bound = 1.0 / jnp.sqrt(fan_in)
        w = jax.random.uniform(kw, (fan_out, fan_in), jnp.float32, -bound, bound)
        b = jax.random.uniform(kb, (fan_out,), jnp.float32, -bound, bound)
        gamma = 1.0 + 0.01 * jax.random.normal(kg, (fan_out,), jnp.float32)
        beta = 0.01 * jax.random.normal(kbeta, (fan_out,), jnp.float32)
        running_mean = 0.01 * jax.random.normal(km, (fan_out,), jnp.float32)
        running_var = jnp.ones((fan_out,), jnp.float32)
        layers.append(dict(w=w, b=b, gamma=gamma, beta=beta,
                           mean=running_mean, var=running_var, eps=eps))
    key, kw, kb = jax.random.split(key, 3)
    bound = 1.0 / jnp.sqrt(hidden_units)
    w = jax.random.uniform(kw, (out_features, hidden_units), jnp.float32, -bound, bound)
    b = jax.random.uniform(kb, (out_features,), jnp.float32, -bound, bound)
    head = dict(w=w, b=b)
    return layers, head


def fold_params_for_kernel(layers, head):
    """Fold eval-mode BN into the preceding Linear and lay out for the kernel.

    Hidden layers:  W' = W^T * scale[None,:]  (bf16, (in, out)),
                    b' = b * scale + shift    (f32,  (1, out)),
      where scale = gamma / sqrt(var + eps),  shift = beta - mean * scale.
    Head weight/bias are zero-padded to a lane-dense multiple of 128 columns.
    """
    params = []
    for L in layers:
        scale = L["gamma"] / jnp.sqrt(L["var"] + L["eps"])
        shift = L["beta"] - L["mean"] * scale
        w_folded = (L["w"].T * scale[None, :]).astype(jnp.bfloat16)
        b_folded = (L["b"] * scale + shift).reshape(1, -1).astype(jnp.float32)
        params += [w_folded, b_folded]

    out_f, hid = head["w"].shape
    out_pad = _round_up(out_f, _LANE)
    w3 = jnp.zeros((hid, out_pad), jnp.float32).at[:, :out_f].set(head["w"].T)
    b3 = jnp.zeros((1, out_pad), jnp.float32).at[0, :out_f].set(head["b"])
    params += [w3.astype(jnp.bfloat16), b3]
    return params


def reference_forward_f32(x, layers, head):
    """Original eval-mode semantics in full f32 (Linear -> BN -> ReLU)x3 -> Linear -> clamp."""
    B = x.shape[0]
    h = x.reshape(B, -1).astype(jnp.float32)
    for L in layers:
        h = h @ L["w"].T + L["b"]
        h = (h - L["mean"]) / jnp.sqrt(L["var"] + L["eps"]) * L["gamma"] + L["beta"]
        h = jnp.maximum(h, 0.0)
    out = h @ head["w"].T + head["b"]
    return jnp.clip(out, 0.001, 0.999)


def reference_forward_bf16(x, kernel_params, out_features):
    """Plain-JAX mimic of the kernel numerics (bf16 matmul operands, f32 accum)."""
    B = x.shape[0]
    w0, b0, w1, b1, w2, b2, w3, b3 = kernel_params
    h = x.reshape(B, -1).astype(jnp.float32).astype(jnp.bfloat16)
    for (w, b) in ((w0, b0), (w1, b1), (w2, b2)):
        h = jnp.dot(h, w, preferred_element_type=jnp.float32) + b
        h = jnp.maximum(h, 0.0).astype(jnp.bfloat16)
    out = jnp.dot(h, w3, preferred_element_type=jnp.float32) + b3
    return jnp.clip(out, 0.001, 0.999)[:, :out_features]


if __name__ == "__main__":
    key = jax.random.PRNGKey(0)
    kx, kp = jax.random.split(key)

    # Shapes consistent with the module: x of shape (B, 4, 4, 4) flattens to
    # (B, 64) -> in_shape = 64, hidden_units = 128, out_shape = 16.
    B, C, H, W = 8, 4, 4, 4
    in_shape = C * H * W
    hidden_units = 128
    out_shape = 16
    num_layer = 3

    x = jax.random.normal(kx, (B, C, H, W), jnp.float32)
    layers, head = init_raw_params(kp, in_shape, hidden_units, out_shape, num_layer)
    kernel_params = fold_params_for_kernel(layers, head)

    out = mlp_forecaster_forward(x, kernel_params, out_shape)
    out = jax.block_until_ready(out)
    assert out.shape == (B, out_shape)

    # Tight check vs. a reference with identical bf16 numerics.
    ref_bf16 = reference_forward_bf16(x, kernel_params, out_shape)
    assert jnp.allclose(out, ref_bf16, atol=2e-3, rtol=2e-3), "mismatch vs bf16 reference"

    # Loose check vs. the original full-f32 eval-mode semantics (bf16 rounding).
    ref_f32 = reference_forward_f32(x, layers, head)
    assert jnp.max(jnp.abs(out - ref_f32)) < 6e-2, "mismatch vs f32 eval-mode reference"

    print("KERNEL_OK")
</pallas_src>

<mosaic_0001>
module attributes {stable_mosaic.version = 11 : i64} {
  func.func @mlp_forecaster_kernel(%arg0: i32, %arg1: memref<8x64xf32, #tpu.memory_space<vmem>>, %arg2: memref<64x128xbf16, #tpu.memory_space<vmem>>, %arg3: memref<1x128xf32, #tpu.memory_space<vmem>>, %arg4: memref<128x128xbf16, #tpu.memory_space<vmem>>, %arg5: memref<1x128xf32, #tpu.memory_space<vmem>>, %arg6: memref<128x128xbf16, #tpu.memory_space<vmem>>, %arg7: memref<1x128xf32, #tpu.memory_space<vmem>>, %arg8: memref<128x128xbf16, #tpu.memory_space<vmem>>, %arg9: memref<1x128xf32, #tpu.memory_space<vmem>>, %arg10: memref<8x128xf32, #tpu.memory_space<vmem>>) attributes {dimension_semantics = [#tpu.dimension_semantics<parallel>], iteration_bounds = array<i64: 1>, scalar_prefetch = 0 : i64, scratch_operands = 0 : i64, tpu.core_type = #tpu.core_type<tc>, window_params = [{transform_indices = @transform_0, window_bounds = array<i64: 8, 64>}, {pipeline_mode = #tpu.pipeline_mode<synchronous>, transform_indices = @transform_1, window_bounds = array<i64: 64, 128>}, {pipeline_mode = #tpu.pipeline_mode<synchronous>, transform_indices = @transform_2, window_bounds = array<i64: 1, 128>}, {pipeline_mode = #tpu.pipeline_mode<synchronous>, transform_indices = @transform_3, window_bounds = array<i64: 128, 128>}, {pipeline_mode = #tpu.pipeline_mode<synchronous>, transform_indices = @transform_4, window_bounds = array<i64: 1, 128>}, {pipeline_mode = #tpu.pipeline_mode<synchronous>, transform_indices = @transform_5, window_bounds = array<i64: 128, 128>}, {pipeline_mode = #tpu.pipeline_mode<synchronous>, transform_indices = @transform_6, window_bounds = array<i64: 1, 128>}, {pipeline_mode = #tpu.pipeline_mode<synchronous>, transform_indices = @transform_7, window_bounds = array<i64: 128, 128>}, {pipeline_mode = #tpu.pipeline_mode<synchronous>, transform_indices = @transform_8, window_bounds = array<i64: 1, 128>}, {transform_indices = @transform_9, window_bounds = array<i64: 8, 128>}]} {
    %c0 = arith.constant 0 : index
    %c0_0 = arith.constant 0 : index
    %0 = vector.load %arg1[%c0, %c0_0] : memref<8x64xf32, #tpu.memory_space<vmem>>, vector<8x64xf32>
    %1 = arith.truncf %0 : vector<8x64xf32> to vector<8x64xbf16>
    %c0_1 = arith.constant 0 : index
    %c0_2 = arith.constant 0 : index
    %2 = vector.load %arg2[%c0_1, %c0_2] : memref<64x128xbf16, #tpu.memory_space<vmem>>, vector<64x128xbf16>
    %cst = arith.constant dense<0.000000e+00> : vector<8x128xf32>
    %3 = tpu.matmul %1, %2, %cst {dimension_numbers = #tpu.dot_dimension_numbers<[1], [0], [0], [1], [0, 0, 1, 1], [], []>} : vector<8x64xbf16>, vector<64x128xbf16>, vector<8x128xf32> -> vector<8x128xf32>
    %c0_3 = arith.constant 0 : index
    %c0_4 = arith.constant 0 : index
    %4 = vector.load %arg3[%c0_3, %c0_4] : memref<1x128xf32, #tpu.memory_space<vmem>>, vector<1x128xf32>
    %5 = vector.broadcast %4 : vector<1x128xf32> to vector<8x128xf32>
    %6 = arith.addf %3, %5 : vector<8x128xf32>
    %cst_5 = arith.constant 0.000000e+00 : f32
    %7 = vector.broadcast %cst_5 : f32 to vector<8x128xf32>
    %8 = arith.maximumf %6, %7 : vector<8x128xf32>
    %9 = arith.truncf %8 : vector<8x128xf32> to vector<8x128xbf16>
    %c0_6 = arith.constant 0 : index
    %c0_7 = arith.constant 0 : index
    %10 = vector.load %arg4[%c0_6, %c0_7] : memref<128x128xbf16, #tpu.memory_space<vmem>>, vector<128x128xbf16>
    %cst_8 = arith.constant dense<0.000000e+00> : vector<8x128xf32>
    %11 = tpu.matmul %9, %10, %cst_8 {dimension_numbers = #tpu.dot_dimension_numbers<[1], [0], [0], [1], [0, 0, 1, 1], [], []>} : vector<8x128xbf16>, vector<128x128xbf16>, vector<8x128xf32> -> vector<8x128xf32>
    %c0_9 = arith.constant 0 : index
    %c0_10 = arith.constant 0 : index
    %12 = vector.load %arg5[%c0_9, %c0_10] : memref<1x128xf32, #tpu.memory_space<vmem>>, vector<1x128xf32>
    %13 = vector.broadcast %12 : vector<1x128xf32> to vector<8x128xf32>
    %14 = arith.addf %11, %13 : vector<8x128xf32>
    %cst_11 = arith.constant 0.000000e+00 : f32
    %15 = vector.broadcast %cst_11 : f32 to vector<8x128xf32>
    %16 = arith.maximumf %14, %15 : vector<8x128xf32>
    %17 = arith.truncf %16 : vector<8x128xf32> to vector<8x128xbf16>
    %c0_12 = arith.constant 0 : index
    %c0_13 = arith.constant 0 : index
    %18 = vector.load %arg6[%c0_12, %c0_13] : memref<128x128xbf16, #tpu.memory_space<vmem>>, vector<128x128xbf16>
    %cst_14 = arith.constant dense<0.000000e+00> : vector<8x128xf32>
    %19 = tpu.matmul %17, %18, %cst_14 {dimension_numbers = #tpu.dot_dimension_numbers<[1], [0], [0], [1], [0, 0, 1, 1], [], []>} : vector<8x128xbf16>, vector<128x128xbf16>, vector<8x128xf32> -> vector<8x128xf32>
    %c0_15 = arith.constant 0 : index
    %c0_16 = arith.constant 0 : index
    %20 = vector.load %arg7[%c0_15, %c0_16] : memref<1x128xf32, #tpu.memory_space<vmem>>, vector<1x128xf32>
    %21 = vector.broadcast %20 : vector<1x128xf32> to vector<8x128xf32>
    %22 = arith.addf %19, %21 : vector<8x128xf32>
    %cst_17 = arith.constant 0.000000e+00 : f32
    %23 = vector.broadcast %cst_17 : f32 to vector<8x128xf32>
    %24 = arith.maximumf %22, %23 : vector<8x128xf32>
    %25 = arith.truncf %24 : vector<8x128xf32> to vector<8x128xbf16>
    %c0_18 = arith.constant 0 : index
    %c0_19 = arith.constant 0 : index
    %26 = vector.load %arg8[%c0_18, %c0_19] : memref<128x128xbf16, #tpu.memory_space<vmem>>, vector<128x128xbf16>
    %cst_20 = arith.constant dense<0.000000e+00> : vector<8x128xf32>
    %27 = tpu.matmul %25, %26, %cst_20 {dimension_numbers = #tpu.dot_dimension_numbers<[1], [0], [0], [1], [0, 0, 1, 1], [], []>} : vector<8x128xbf16>, vector<128x128xbf16>, vector<8x128xf32> -> vector<8x128xf32>
    %c0_21 = arith.constant 0 : index
    %c0_22 = arith.constant 0 : index
    %28 = vector.load %arg9[%c0_21, %c0_22] : memref<1x128xf32, #tpu.memory_space<vmem>>, vector<1x128xf32>
    %29 = vector.broadcast %28 : vector<1x128xf32> to vector<8x128xf32>
    %30 = arith.addf %27, %29 : vector<8x128xf32>
    %cst_23 = arith.constant 1.000000e-03 : f32
    %cst_24 = arith.constant 9.990000e-01 : f32
    %31 = vector.broadcast %cst_23 : f32 to vector<8x128xf32>
    %32 = arith.maximumf %31, %30 : vector<8x128xf32>
    %33 = vector.broadcast %cst_24 : f32 to vector<8x128xf32>
    %34 = arith.minimumf %33, %32 : vector<8x128xf32>
    %c0_25 = arith.constant 0 : index
    %c0_26 = arith.constant 0 : index
    %35 = vector.load %arg10[%c0_25, %c0_26] : memref<8x128xf32, #tpu.memory_space<vmem>>, vector<8x128xf32>
    tpu.vector_store %arg10[%c0_25, %c0_26], %34 {strides = array<i32>} : memref<8x128xf32, #tpu.memory_space<vmem>>, vector<8x128xf32>,
    return
  }
  func.func @transform_0(%arg0: i32) -> (i32, i32) {
    %c0_i32 = arith.constant 0 : i32
    %c0_i32_0 = arith.constant 0 : i32
    return %arg0, %c0_i32 : i32, i32
  }
  func.func @transform_1(%arg0: i32) -> (i32, i32) {
    %c0_i32 = arith.constant 0 : i32
    %c0_i32_0 = arith.constant 0 : i32
    %c0_i32_1 = arith.constant 0 : i32
    return %c0_i32, %c0_i32_0 : i32, i32
  }
  func.func @transform_2(%arg0: i32) -> (i32, i32) {
    %c0_i32 = arith.constant 0 : i32
    %c0_i32_0 = arith.constant 0 : i32
    %c0_i32_1 = arith.constant 0 : i32
    return %c0_i32, %c0_i32_0 : i32, i32
  }
  func.func @transform_3(%arg0: i32) -> (i32, i32) {
    %c0_i32 = arith.constant 0 : i32
    %c0_i32_0 = arith.constant 0 : i32
    %c0_i32_1 = arith.constant 0 : i32
    return %c0_i32, %c0_i32_0 : i32, i32
  }
  func.func @transform_4(%arg0: i32) -> (i32, i32) {
    %c0_i32 = arith.constant 0 : i32
    %c0_i32_0 = arith.constant 0 : i32
    %c0_i32_1 = arith.constant 0 : i32
    return %c0_i32, %c0_i32_0 : i32, i32
  }
  func.func @transform_5(%arg0: i32) -> (i32, i32) {
    %c0_i32 = arith.constant 0 : i32
    %c0_i32_0 = arith.constant 0 : i32
    %c0_i32_1 = arith.constant 0 : i32
    return %c0_i32, %c0_i32_0 : i32, i32
  }
  func.func @transform_6(%arg0: i32) -> (i32, i32) {
    %c0_i32 = arith.constant 0 : i32
    %c0_i32_0 = arith.constant 0 : i32
    %c0_i32_1 = arith.constant 0 : i32
    return %c0_i32, %c0_i32_0 : i32, i32
  }
  func.func @transform_7(%arg0: i32) -> (i32, i32) {
    %c0_i32 = arith.constant 0 : i32
    %c0_i32_0 = arith.constant 0 : i32
    %c0_i32_1 = arith.constant 0 : i32
    return %c0_i32, %c0_i32_0 : i32, i32
  }
  func.func @transform_8(%arg0: i32) -> (i32, i32) {
    %c0_i32 = arith.constant 0 : i32
    %c0_i32_0 = arith.constant 0 : i32
    %c0_i32_1 = arith.constant 0 : i32
    return %c0_i32, %c0_i32_0 : i32, i32
  }
  func.func @transform_9(%arg0: i32) -> (i32, i32) {
    %c0_i32 = arith.constant 0 : i32
    %c0_i32_0 = arith.constant 0 : i32
    return %arg0, %c0_i32 : i32, i32
  }
}

</mosaic_0001>

<bundles_post_ra>
// kernel: mlp_forecaster_forward.1
= control target key start
LH: loop header
LB: loop body
LE: loop exit
PB: predicated region body
PF: predicated region fallthrough
CT: control target
= control target key end

     0   :  { %14 = vsyncpa [#allocation3], 0  ;;  %s922_s0 = inlined_call_operand.vmem [shape: f32[8,64], index: 0, kind: input, shape index: {}]   ;;  %s923_s1 = inlined_call_operand.hbm [shape: bf16[64,128], index: 1, kind: input, shape index: {}]   ;;  %s924_s2 = inlined_call_operand.vmem [shape: f32[1,128], index: 2, kind: input, shape index: {}]   ;;  %s925_s3 = inlined_call_operand.vmem [shape: bf16[128,128], index: 3, kind: input, shape index: {}]   ;;  %s926_s4 = inlined_call_operand.vmem [shape: f32[1,128], index: 4, kind: input, shape index: {}]   ;;  %s927_s5 = inlined_call_operand.hbm [shape: bf16[128,128], index: 5, kind: input, shape index: {}]   ;;  %s928_s6 = inlined_call_operand.vmem [shape: f32[1,128], index: 6, kind: input, shape index: {}]   ;;  %s929_s7 = inlined_call_operand.hbm [shape: bf16[128,128], index: 7, kind: input, shape index: {}]   ;;  %s930_s8 = inlined_call_operand.vmem [shape: f32[1,128], index: 8, kind: input, shape index: {}]   ;;  %s931_s9 = inlined_call_operand.hbm [shape: f32[8,128], index: 9, kind: output, shape index: {}]  }
   0x1   :  { %15 = vsyncpa [#allocation6], 0 }
   0x2   :  { %16 = vsyncpa [#allocation4], 0  ;;  %s777_s30 = smov [#allocation5]   ;;  %s778_s11 = smov [#allocation2]  }
   0x3   :  { %s42_s10 = sshll.u32 %s777_s30, 4  ;;  %s24_s12 = sshll.u32 %s778_s11, 4  ;;  %s43_s10 = int_to_ptr.vmem [resolvable:$true] %s42_s10  ;;  %s25_s12 = int_to_ptr.vmem [resolvable:$true] %s24_s12 }
   0x4   :  { %s699_s13 = scalar_lea.vmem %s43_s10, 1024  ;;  %p704_p1 = scmp.lt.s32.totalorder %s43_s10, %s43_s10 }
   0x5   :  { %p700_p0 = scmp.ne.s32.totalorder %s43_s10, %s699_s13  ;;  %p705_p2 = scmp.lt.s32.totalorder %s699_s13, %s699_s13 }
   0x7   :  { %p706_p3 = por %p705_p2, %p704_p1 }
   0x9   :  { %p707_p4 = pnand %p706_p3, %p700_p0 }
   0xb   :  { %710 = shalt.err (!%p707_p4)
}
   0xc   :  { %s779_s14 = smov 64   ;;  %s780_s15 = smov 4  }
   0xd   :  { %48 = dma.hbm_to_vmem [thread:$0]  %s927_s5, 1024, %s43_s10, [#allocation6], %s779_s14, %s779_s14, %s780_s15  }
   0xe   :  { %s719_s18 = scalar_lea.vmem %s25_s12, 512  ;;  %p724_p6 = scmp.lt.s32.totalorder %s25_s12, %s25_s12 }
   0xf   :  { %p720_p5 = scmp.ne.s32.totalorder %s25_s12, %s719_s18  ;;  %p725_p7 = scmp.lt.s32.totalorder %s719_s18, %s719_s18 }
  0x11   :  { %p726_p8 = por %p725_p7, %p724_p6 }
  0x13   :  { %p727_p9 = pnand %p726_p8, %p720_p5 }
  0x15   :  { %730 = shalt.err (!%p727_p9)
}
  0x16   :  { %30 = dma.hbm_to_vmem [thread:$0]  %s923_s1, 512, %s25_s12, [#allocation3], %s779_s14, %s779_s14, %s780_s15  }
  0x17   :  { %s781_s21 = smov [#allocation7]  }
  0x18   :  { %s56_s22 = sshll.u32 %s781_s21, 4  ;;  %s57_s22 = int_to_ptr.vmem [resolvable:$true] %s56_s22 }
  0x19   :  { %s739_s23 = scalar_lea.vmem %s57_s22, 1024  ;;  %p744_p11 = scmp.lt.s32.totalorder %s57_s22, %s57_s22 }
  0x1a   :  { %p740_p10 = scmp.ne.s32.totalorder %s57_s22, %s739_s23  ;;  %p745_p12 = scmp.lt.s32.totalorder %s739_s23, %s739_s23 }
  0x1c   :  { %p746_p13 = por %p745_p12, %p744_p11 }
  0x1e   :  { %p747_p0 = pnand %p746_p13, %p740_p10 }
  0x20   :  { %750 = shalt.err (!%p747_p0)
}
  0x21   :  { %62 = dma.hbm_to_vmem [thread:$0]  %s929_s7, 1024, %s57_s22, [#allocation6], %s779_s14, %s779_s14, %s780_s15  }
  0x22   :  { %771 = dma.done.wait [#allocation3], 512  }
  0x23   :  { %772 = vsyncadd [#allocation3], 4294966784 }
  0x24   :  { %773 = dma.done.wait [#allocation6], 2048  }
  0x25   :  { %774 = vsyncadd [#allocation6], 4294965248  ;;  %v782_v0 = vmov 0.0   ;;  %vm783_vm0 = vmmov 0   ;;  %v663_v1 = vld [vmem:[#allocation2 + $0x18] sm:$0xff]   ;;  %v664_v2 = vld [vmem:[#allocation2 + $0x10] sm:$0xff]  }
  0x26   :  { %583 = vmatprep.subr.bf16.mxu0 %v782_v0  ;;  %591 = vmatprep.mubr.msk.bf16.mxu0 %vm783_vm0, %v782_v0  ;;  %v667_v3 = vld [vmem:[%s925_s3 + $0x38] sm:$0xff]   ;;  %v665_v4 = vld [vmem:[#allocation2 + $0x8] sm:$0xff]   ;;  %v668_v5 = vld [vmem:[%s925_s3 + $0x30] sm:$0xff]   ;;  %vm116_vm1 = vcmask 523264   ;;  %s784_s5 = smov [#allocation8]  }
  0x27   :  { %595 = vmatprep.subr.bf16.mxu1 %v782_v0  ;;  %611 = vmatprep.mubr.msk.bf16.mxu1 %vm783_vm0, %v782_v0  ;;  %v666_v6 = vld [vmem:[#allocation2] sm:$0xff]   ;;  %v669_v8 = vld [vmem:[%s925_s3 + $0x28] sm:$0xff]   ;;  %v671_v11 = vld [vmem:[%s925_s3 + $0x18] sm:$0xff]   ;;  %s508_s24 = sshll.u32 %s784_s5, 4  ;;  %s509_s24 = int_to_ptr.vmem [resolvable:$true] %s508_s24 }
  0x28   :  { %584 = vmatpush3.bf16.msra.mxu0 %v663_v1  ;;  %596 = vmatpush3.bf16.msra.mxu1 %v667_v3  ;;  %v75_v7 = vld [vmem:[%s922_s0] sm:$0xff]  ;;  %v672_v12 = vld [vmem:[%s925_s3 + $0x10] sm:$0xff]   ;;  %v673_v13 = vld [vmem:[%s925_s3 + $0x8] sm:$0xff]   ;;  %p756_p2 = scmp.lt.s32.totalorder %s509_s24, %s509_s24 }
  0x29   :  { %585 = vmatprep.subr.bf16.mxu0 %v782_v0  ;;  %597 = vmatprep.subr.bf16.mxu1 %v782_v0  ;;  %v76_v9 = vpack.c.bf16 %v75_v7, %v75_v7  ;;  %v670_v10 = vld [vmem:[%s925_s3 + $0x20] sm:$0xff]   ;;  %v675_v15 = vld [vmem:[#allocation5 + $0x38] sm:$0xff]   ;;  %v676_v16 = vld [vmem:[#allocation5 + $0x30] sm:$0xff]  }
  0x2a   :  { %v674_v14 = vld [vmem:[%s925_s3] sm:$0xff]   ;;  %v677_v17 = vld [vmem:[#allocation5 + $0x28] sm:$0xff]   ;;  %v679_v19 = vld [vmem:[#allocation5 + $0x18] sm:$0xff]  }
  0x2b   :  { %v678_v18 = vld [vmem:[#allocation5 + $0x20] sm:$0xff]   ;;  %v680_v20 = vld [vmem:[#allocation5 + $0x10] sm:$0xff]   ;;  %v681_v29 = vld [vmem:[#allocation5 + $0x8] sm:$0xff]  }
  0x2c   :  { %586 = vmatpush3.bf16.msra.mxu0 %v664_v2  ;;  %598 = vmatpush3.bf16.msra.mxu1 %v668_v5  ;;  %v518_v21 = vld [vmem:[%s924_s2] ss:$0 sm:$0xff]  ;;  %v683_v31 = vld [vmem:[#allocation7 + $0x38] sm:$0xff]   ;;  %v684_v32 = vld [vmem:[#allocation7 + $0x30] sm:$0xff]  }
  0x2d   :  { %587 = vmatprep.subr.bf16.mxu0 %v782_v0  ;;  %599 = vmatprep.subr.bf16.mxu1 %v782_v0  ;;  %v682_v30 = vld [vmem:[#allocation5] sm:$0xff]   ;;  %v685_v33 = vld [vmem:[#allocation7 + $0x28] sm:$0xff]   ;;  %v687_v35 = vld [vmem:[#allocation7 + $0x18] sm:$0xff]  }
  0x2e   :  { %v686_v34 = vld [vmem:[#allocation7 + $0x20] sm:$0xff]   ;;  %v688_v36 = vld [vmem:[#allocation7 + $0x10] sm:$0xff]   ;;  %v689_v45 = vld [vmem:[#allocation7 + $0x8] sm:$0xff]  }
  0x2f   :  { %v524_v37 = vld [vmem:[%s926_s4] ss:$0 sm:$0xff] }
  0x30   :  { %588 = vmatpush3.bf16.msra.mxu0 %v665_v4  ;;  %600 = vmatpush3.bf16.msra.mxu1 %v669_v8  ;;  %v690_v46 = vld [vmem:[#allocation7] sm:$0xff]  }
  0x31   :  { %589 = vmatprep.subr.bf16.mxu0 %v782_v0  ;;  %601 = vmatprep.subr.bf16.mxu1 %v782_v0  ;;  %v533_v47 = vld [vmem:[%s928_s6] ss:$0 sm:$0xff]  ;;  %s751_s6 = scalar_lea.vmem %s509_s24, 128 }
  0x32   :  { %v542_v55 = vld [vmem:[%s930_s8] ss:$0 sm:$0xff]  ;;  %p752_p1 = scmp.ne.s32.totalorder %s509_s24, %s751_s6  ;;  %p757_p3 = scmp.lt.s32.totalorder %s751_s6, %s751_s6 }
  0x34   :  { %590 = vmatpush3.bf16.msra.mxu0 %v666_v6  ;;  %602 = vmatpush3.bf16.msra.mxu1 %v670_v10  ;;  %p758_p4 = por %p757_p3, %p756_p2 }
  0x35   :  { %615 = vmatprep.subr.bf16.mxu0 %v782_v0  ;;  %603 = vmatprep.subr.bf16.mxu1 %v782_v0 }
  0x36   :  { %p759_p5 = pnand %p758_p4, %p752_p1 }
  0x37   :  { %592 = vmatmul.mubr.msk.bf16.vlgmr.msra.gmra.mxu0 %vm116_vm1, %v76_v9 }
  0x38   :  { %631 = vmatprep.mubr.msk.bf16.mxu0 %vm783_vm0, %v782_v0  ;;  %604 = vmatpush3.bf16.msra.mxu1 %v671_v11 }
  0x39   :  { %605 = vmatprep.subr.bf16.mxu1 %v782_v0  ;;  %616 = vmatpush3.bf16.msra.mxu0 %v675_v15 }
  0x3a   :  { %617 = vmatprep.subr.bf16.mxu0 %v782_v0 }
  0x3c   :  { %606 = vmatpush3.bf16.msra.mxu1 %v672_v12 }
  0x3d   :  { %607 = vmatprep.subr.bf16.mxu1 %v782_v0  ;;  %618 = vmatpush3.bf16.msra.mxu0 %v676_v16 }
  0x3e   :  { %619 = vmatprep.subr.bf16.mxu0 %v782_v0 }
  0x40   :  { %608 = vmatpush3.bf16.msra.mxu1 %v673_v13 }
  0x41   :  { %609 = vmatprep.subr.bf16.mxu1 %v782_v0  ;;  %620 = vmatpush3.bf16.msra.mxu0 %v677_v17 }
  0x42   :  { %621 = vmatprep.subr.bf16.mxu0 %v782_v0 }
  0x44   :  { %610 = vmatpush3.bf16.msra.mxu1 %v674_v14 }
  0x45   :  { %635 = vmatprep.subr.bf16.mxu1 %v782_v0  ;;  %622 = vmatpush3.bf16.msra.mxu0 %v678_v18 }
  0x46   :  { %623 = vmatprep.subr.bf16.mxu0 %v782_v0 }
  0x49   :  { %624 = vmatpush3.bf16.msra.mxu0 %v679_v19 }
  0x4a   :  { %625 = vmatprep.subr.bf16.mxu0 %v782_v0 }
  0x4d   :  { %626 = vmatpush3.bf16.msra.mxu0 %v680_v20 }
  0x4e   :  { %627 = vmatprep.subr.bf16.mxu0 %v782_v0 }
  0x51   :  { %628 = vmatpush3.bf16.msra.mxu0 %v681_v29 }
  0x52   :  { %629 = vmatprep.subr.bf16.mxu0 %v782_v0 }
  0x55   :  { %630 = vmatpush3.bf16.msra.mxu0 %v682_v30 }
  0xf7   :  { %v154_v22 = vpop.f32.mrf.mxu0 }
  0xf8   :  { %v155_v23 = vadd.f32 %v518_v21, %v154_v22 }
  0xf9   :  { %v593_v24 = vpop.f32.mrf.mxu0 }
  0xfa   :  { %v160_v25 = vmax.f32 %v155_v23, 0.0 }
  0xfb   :  { %v157_v26 = vpop.f32.mrf.mxu0 }
  0xfc   :  { %v161_v27 = vpack.c.bf16 %v160_v25, %v160_v25 }
  0xfd   :  { %v594_v28 = vpop.f32.mrf.mxu0 }
  0xfe   :  { %612 = vmatmul.mubr.bf16.vlgmr.msra.gmra.mxu1 %v161_v27 }
  0xff   :  { %651 = vmatprep.mubr.msk.bf16.mxu1 %vm783_vm0, %v782_v0  ;;  %636 = vmatpush3.bf16.msra.mxu1 %v683_v31 }
 0x100   :  { %637 = vmatprep.subr.bf16.mxu1 %v782_v0 }
 0x103   :  { %638 = vmatpush3.bf16.msra.mxu1 %v684_v32 }
 0x104   :  { %639 = vmatprep.subr.bf16.mxu1 %v782_v0 }
 0x107   :  { %640 = vmatpush3.bf16.msra.mxu1 %v685_v33 }
 0x108   :  { %641 = vmatprep.subr.bf16.mxu1 %v782_v0 }
 0x10b   :  { %642 = vmatpush3.bf16.msra.mxu1 %v686_v34 }
 0x10c   :  { %643 = vmatprep.subr.bf16.mxu1 %v782_v0 }
 0x10f   :  { %644 = vmatpush3.bf16.msra.mxu1 %v687_v35 }
 0x110   :  { %645 = vmatprep.subr.bf16.mxu1 %v782_v0 }
 0x113   :  { %646 = vmatpush3.bf16.msra.mxu1 %v688_v36 }
 0x114   :  { %647 = vmatprep.subr.bf16.mxu1 %v782_v0 }
 0x117   :  { %648 = vmatpush3.bf16.msra.mxu1 %v689_v45 }
 0x118   :  { %649 = vmatprep.subr.bf16.mxu1 %v782_v0 }
 0x11b   :  { %650 = vmatpush3.bf16.msra.mxu1 %v690_v46 }
 0x1be   :  { %v267_v38 = vpop.f32.mrf.mxu1 }
 0x1bf   :  { %v268_v39 = vadd.f32 %v524_v37, %v267_v38 }
 0x1c0   :  { %v613_v40 = vpop.f32.mrf.mxu1 }
 0x1c1   :  { %v273_v41 = vmax.f32 %v268_v39, 0.0 }
 0x1c2   :  { %v270_v42 = vpop.f32.mrf.mxu1 }
 0x1c3   :  { %v274_v43 = vpack.c.bf16 %v273_v41, %v273_v41 }
 0x1c4   :  { %v614_v44 = vpop.f32.mrf.mxu1 }
 0x1c5   :  { %632 = vmatmul.mubr.bf16.vlgmr.msra.gmra.mxu0 %v274_v43 }
 0x285   :  { %v380_v48 = vpop.f32.mrf.mxu0 }
 0x286   :  { %v381_v49 = vadd.f32 %v533_v47, %v380_v48 }
 0x287   :  { %v633_v50 = vpop.f32.mrf.mxu0 }
 0x288   :  { %v386_v51 = vmax.f32 %v381_v49, 0.0 }
 0x289   :  { %v383_v52 = vpop.f32.mrf.mxu0 }
 0x28a   :  { %v387_v53 = vpack.c.bf16 %v386_v51, %v386_v51 }
 0x28b   :  { %v634_v54 = vpop.f32.mrf.mxu0 }
 0x28c   :  { %652 = vmatmul.mubr.bf16.vlgmr.msra.gmra.mxu1 %v387_v53 }
 0x34c   :  { %v493_v56 = vpop.f32.mrf.mxu1 }
 0x34d   :  { %v494_v57 = vadd.f32 %v542_v55, %v493_v56 }
 0x34e   :  { %v653_v58 = vpop.f32.mrf.mxu1 }
 0x34f   :  { %v499_v59 = vmax.f32 %v494_v57, 0.001 }
 0x350   :  { %v496_v60 = vpop.f32.mrf.mxu1 }
 0x351   :  { %v500_v61 = vmin.f32 %v499_v59, 0.999 }
 0x352   :  { %v654_v62 = vpop.f32.mrf.mxu1 }
 0x353   :  { %501 = vst [vmem:[#allocation8] sm:$0xff] %v500_v61 }
 0x354   :  { %762 = shalt.err (!%p759_p5)
}
 0x355   :  { %511 = dma.vmem_to_hbm [thread:$0]  %s509_s24, 128, %s931_s9, [#allocation4]  }
 0x356   :  { %775 = dma.done.wait [#allocation4], 128  }
 0x357   :  { %776 = vsyncadd [#allocation4], 4294967168 }
 0x358   :  { %515 = vsyncpa [#allocation3], 1 }
 0x359   :  { %516 = vsyncpa [#allocation6], 1 }
 0x35a   :  { %517 = vsyncpa [#allocation4], 1 }

</bundles_post_ra>
